<compile_context>
chip_gen: v7x
topology: tpu7x:2x2x1
jax: 0.10.0
libtpu: 0.0.40
codegen_flags: <defaults>
</compile_context>

<pallas_src>
import functools

import jax
import jax.numpy as jnp
from jax.experimental import pallas as pl
from jax.experimental.pallas import tpu as pltpu

_EPS = 1e-15


def _round_up(a, b):
    return (a + b - 1) // b * b


def _pick_tn(n, d_pad, tk, budget_bytes=40 * 1024 * 1024):
    """Largest batch tile whose double-buffered blocks fit the VMEM budget."""
    w_bytes = 2 * d_pad * tk * 4                       # weight block, 2 buffers
    for tn in (512, 256, 128, 64, 32, 16, 8):
        need = w_bytes + 2 * tn * d_pad * 4 + 2 * tn * tk * 4
        if need <= budget_bytes:
            return tn
    return 8


def _busemann_mlr_kernel(x_ref, wt_ref, bp_ref, o_ref, *, c, inv_sqrt_c):
    """One (batch-tile, class-tile) block of the Busemann MLR.

    x_ref : (TN, Dp)  input rows (zero-padded feature axis)
    wt_ref: (Dp, TK)  2*sqrt(c) * normalized ideal-point directions, transposed
    bp_ref: (1, TK)   precomputed B_w(p) per class
    o_ref : (TN, TK)  output distances
    """
    x = x_ref[...]
    # <x, 2*sqrt(c)*w_k> for the class tile (MXU matmul, f32 accumulate).
    dot = jnp.dot(x, wt_ref[...], preferred_element_type=jnp.float32)  # (TN,TK)
    # Per-row quantities (VPU + XLU reduce, only (TN,1) wide).
    xsq = jnp.sum(x * x, axis=-1, keepdims=True)                       # (TN, 1)
    row = 1.0 + c * xsq                                                # (TN, 1)

    # ||w - sqrt(c) x||^2 = 1 + c ||x||^2 - 2 sqrt(c) <x,w>   (||w|| = 1)
    num = jnp.maximum(row - dot, _EPS)                                 # (TN,TK)
    den = jnp.maximum(2.0 - row, _EPS)     # = 1 - c ||x||^2           # (TN, 1)

    # dist = B_w(p) - B_w(x) = bp - (log(num) - log(den)) / sqrt_c.
    # log(den) is per-row only (TN logs instead of TN*TK).
    o_ref[...] = (bp_ref[...]
                  + inv_sqrt_c * (jnp.log(den) - jnp.log(num))).astype(o_ref.dtype)


def busemann_poincare_mlr(x, point, tangent, c):
    """Forward pass of BusemannPoincareMLR.

    x:       (..., feat_dim) float32   (leading dims are flattened)
    point:   (num_outcome, feat_dim) float32  (tangent-space parameter)
    tangent: (num_outcome, feat_dim) float32
    returns: (N, num_outcome) float32
    """
    x = x.reshape(-1, point.shape[-1]).astype(jnp.float32)
    n, d = x.shape
    k = point.shape[0]
    c = float(c)
    sqrt_c = c ** 0.5
    inv_sqrt_c = 1.0 / sqrt_c

    # --- glue (per-class precompute, O(K*D)) -------------------------------
    p_norm = jnp.clip(jnp.linalg.norm(point, axis=-1, keepdims=True), _EPS, None)
    p_ball = jnp.tanh(sqrt_c * p_norm) * point / (sqrt_c * p_norm)      # expmap0
    w = tangent / jnp.clip(jnp.linalg.norm(tangent, axis=-1, keepdims=True),
                           _EPS, None)                                   # (K, D)

    p_sq = jnp.sum(p_ball * p_ball, axis=-1)                             # (K,)
    p_dot_w = jnp.sum(p_ball * w, axis=-1)                               # (K,)
    b_p = jnp.log(jnp.maximum(1.0 - 2.0 * sqrt_c * p_dot_w + c * p_sq, _EPS)
                  / jnp.maximum(1.0 - c * p_sq, _EPS)) / sqrt_c          # (K,)

    # Fold 2*sqrt(c) into the (already required) O(K*D) normalization pass so
    # the kernel's hot (TN,TK) tile does not pay a per-element multiply.
    w_scaled = (2.0 * sqrt_c) * w                                        # (K, D)

    # --- padding / tiling (lane-dense layout) ------------------------------
    d_pad = _round_up(d, 128)                  # feature axis -> full 128 lanes
    k_pad = _round_up(k, 128)                  # class axis  -> lane-dense store
    tk = 256 if k_pad % 256 == 0 else 128      # MXU-native 256 on v6e/v7x
    tn_cap = _pick_tn(n, d_pad, tk)
    if n <= tn_cap:
        tn = _round_up(n, 8)
        n_pad = tn
    else:
        tn = tn_cap
        n_pad = _round_up(n, tn)

    x_p = jnp.pad(x, ((0, n_pad - n), (0, d_pad - d)))
    w_t = jnp.pad(jnp.transpose(w_scaled).astype(jnp.float32),
                  ((0, d_pad - d), (0, k_pad - k)))                      # (Dp,Kp)
    b_p = jnp.pad(b_p.reshape(1, k).astype(jnp.float32),
                  ((0, 0), (0, k_pad - k)))                              # (1, Kp)

    grid = (n_pad // tn, k_pad // tk)

    # --- Pallas hot path ----------------------------------------------------
    kernel = functools.partial(_busemann_mlr_kernel, c=c, inv_sqrt_c=inv_sqrt_c)
    cost = pl.CostEstimate(
        flops=2 * n_pad * d_pad * k_pad,
        transcendentals=n_pad * (k_pad + 1),
        bytes_accessed=4 * (n_pad * d_pad
                            + (n_pad // tn) * d_pad * k_pad   # w re-streamed per batch tile
                            + k_pad
                            + n_pad * k_pad),
    )
    out = pl.pallas_call(
        kernel,
        out_shape=jax.ShapeDtypeStruct((n_pad, k_pad), jnp.float32),
        grid_spec=pltpu.PrefetchScalarGridSpec(
            num_scalar_prefetch=0,
            grid=grid,
            in_specs=[
                pl.BlockSpec((tn, d_pad), lambda i, j: (i, 0)),   # x rows tile
                pl.BlockSpec((d_pad, tk), lambda i, j: (0, j)),   # directions
                pl.BlockSpec((1, tk), lambda i, j: (0, j)),       # B_w(p)
            ],
            out_specs=pl.BlockSpec((tn, tk), lambda i, j: (i, j)),
        ),
        compiler_params=pltpu.CompilerParams(
            dimension_semantics=("parallel", "parallel"),
            vmem_limit_bytes=48 * 1024 * 1024,   # safe on v7x's 64 MiB VMEM
        ),
        cost_estimate=cost,
    )(x_p, w_t, b_p)
    return out[:n, :k]


def _reference(x, point, tangent, c):
    """Pure-JAX reference of the same math, for a correctness check."""
    x = x.reshape(-1, point.shape[-1]).astype(jnp.float32)
    c = float(c)
    sqrt_c = c ** 0.5
    p_norm = jnp.clip(jnp.linalg.norm(point, axis=-1, keepdims=True), _EPS, None)
    p_ball = jnp.tanh(sqrt_c * p_norm) * point / (sqrt_c * p_norm)
    w = tangent / jnp.clip(jnp.linalg.norm(tangent, axis=-1, keepdims=True),
                           _EPS, None)

    def busemann(z):                                   # z: (M, D) -> (M, K)
        zsq = jnp.sum(z * z, axis=-1, keepdims=True)
        dot = z @ w.T
        num = jnp.maximum(1.0 - 2.0 * sqrt_c * dot + c * zsq, _EPS)
        den = jnp.maximum(1.0 - c * zsq, _EPS)
        return jnp.log(num / den) / sqrt_c

    b_p = jnp.diagonal(busemann(p_ball))               # B_{w_i}(p_i), (K,)
    return b_p[None, :] - busemann(x)


if __name__ == "__main__":
    # Small shapes consistent with the module: N feature rows of feat_dim,
    # num_outcome classes.
    batch, feat_dim, num_outcome = 8, 32, 16
    c = 1.0
    INIT_EPS = 0.001

    key = jax.random.PRNGKey(0)
    k_x, k_p, k_t = jax.random.split(key, 3)

    # Inputs: keep them well inside the Poincare ball (norm < 1/sqrt(c)).
    x = 0.3 * jax.random.normal(k_x, (batch, feat_dim), dtype=jnp.float32)
    x = x / (1.0 + jnp.linalg.norm(x, axis=-1, keepdims=True))

    # Deterministic parameter init, matching torch.randn(...) * INIT_EPS shapes.
    point = INIT_EPS * jax.random.normal(k_p, (num_outcome, feat_dim),
                                         dtype=jnp.float32)
    tangent = INIT_EPS * jax.random.normal(k_t, (num_outcome, feat_dim),
                                           dtype=jnp.float32)

    out = busemann_poincare_mlr(x, point, tangent, c)
    out = jax.block_until_ready(out)

    ref = jax.block_until_ready(_reference(x, point, tangent, c))
    assert out.shape == (batch, num_outcome)
    assert jnp.allclose(out, ref, atol=1e-5, rtol=1e-5), "kernel != reference"

    print("KERNEL_OK")
</pallas_src>

<mosaic_0001>
module attributes {stable_mosaic.version = 11 : i64} {
  func.func @_busemann_mlr_kernel(%arg0: i32, %arg1: i32, %arg2: memref<8x128xf32, #tpu.memory_space<vmem>>, %arg3: memref<128x128xf32, #tpu.memory_space<vmem>>, %arg4: memref<1x128xf32, #tpu.memory_space<vmem>>, %arg5: memref<8x128xf32, #tpu.memory_space<vmem>>) attributes {dimension_semantics = [#tpu.dimension_semantics<parallel>, #tpu.dimension_semantics<parallel>], iteration_bounds = array<i64: 1, 1>, scalar_prefetch = 0 : i64, scratch_operands = 0 : i64, tpu.core_type = #tpu.core_type<tc>, window_params = [{transform_indices = @transform_0, window_bounds = array<i64: 8, 128>}, {transform_indices = @transform_1, window_bounds = array<i64: 128, 128>}, {transform_indices = @transform_2, window_bounds = array<i64: 1, 128>}, {transform_indices = @transform_3, window_bounds = array<i64: 8, 128>}]} {
    %c0 = arith.constant 0 : index
    %c0_0 = arith.constant 0 : index
    %0 = vector.load %arg2[%c0, %c0_0] : memref<8x128xf32, #tpu.memory_space<vmem>>, vector<8x128xf32>
    %c0_1 = arith.constant 0 : index
    %c0_2 = arith.constant 0 : index
    %1 = vector.load %arg3[%c0_1, %c0_2] : memref<128x128xf32, #tpu.memory_space<vmem>>, vector<128x128xf32>
    %cst = arith.constant dense<0.000000e+00> : vector<8x128xf32>
    %2 = tpu.matmul %0, %1, %cst {dimension_numbers = #tpu.dot_dimension_numbers<[1], [0], [0], [1], [0, 0, 1, 1], [], []>} : vector<8x128xf32>, vector<128x128xf32>, vector<8x128xf32> -> vector<8x128xf32>
    %3 = arith.mulf %0, %0 : vector<8x128xf32>
    %cst_3 = arith.constant dense<0.000000e+00> : vector<8xf32>
    %4 = vector.multi_reduction <add>, %3, %cst_3 [1] : vector<8x128xf32> to vector<8xf32>
    %5 = vector.shape_cast %4 : vector<8xf32> to vector<8x1xf32>
    %cst_4 = arith.constant 1.000000e+00 : f32
    %6 = vector.broadcast %cst_4 : f32 to vector<8x1xf32>
    %7 = arith.mulf %6, %5 : vector<8x1xf32>
    %cst_5 = arith.constant 1.000000e+00 : f32
    %8 = vector.broadcast %cst_5 : f32 to vector<8x1xf32>
    %9 = arith.addf %8, %7 : vector<8x1xf32>
    %10 = vector.broadcast %9 : vector<8x1xf32> to vector<8x128xf32>
    %11 = arith.subf %10, %2 : vector<8x128xf32>
    %cst_6 = arith.constant 1.000000e-15 : f32
    %12 = vector.broadcast %cst_6 : f32 to vector<8x128xf32>
    %13 = arith.maximumf %11, %12 : vector<8x128xf32>
    %cst_7 = arith.constant 2.000000e+00 : f32
    %14 = vector.broadcast %cst_7 : f32 to vector<8x1xf32>
    %15 = arith.subf %14, %9 : vector<8x1xf32>
    %cst_8 = arith.constant 1.000000e-15 : f32
    %16 = vector.broadcast %cst_8 : f32 to vector<8x1xf32>
    %17 = arith.maximumf %15, %16 : vector<8x1xf32>
    %c0_9 = arith.constant 0 : index
    %c0_10 = arith.constant 0 : index
    %18 = vector.load %arg4[%c0_9, %c0_10] : memref<1x128xf32, #tpu.memory_space<vmem>>, vector<1x128xf32>
    %19 = math.log %17 : vector<8x1xf32>
    %20 = math.log %13 : vector<8x128xf32>
    %21 = vector.broadcast %19 : vector<8x1xf32> to vector<8x128xf32>
    %22 = arith.subf %21, %20 : vector<8x128xf32>
    %cst_11 = arith.constant 1.000000e+00 : f32
    %23 = vector.broadcast %cst_11 : f32 to vector<8x128xf32>
    %24 = arith.mulf %23, %22 : vector<8x128xf32>
    %25 = vector.broadcast %18 : vector<1x128xf32> to vector<8x128xf32>
    %26 = arith.addf %25, %24 : vector<8x128xf32>
    %c0_12 = arith.constant 0 : index
    %c0_13 = arith.constant 0 : index
    %27 = vector.load %arg5[%c0_12, %c0_13] : memref<8x128xf32, #tpu.memory_space<vmem>>, vector<8x128xf32>
    tpu.vector_store %arg5[%c0_12, %c0_13], %26 {strides = array<i32>} : memref<8x128xf32, #tpu.memory_space<vmem>>, vector<8x128xf32>,
    return
  }
  func.func @transform_0(%arg0: i32, %arg1: i32) -> (i32, i32) {
    %c0_i32 = arith.constant 0 : i32
    %c0_i32_0 = arith.constant 0 : i32
    return %arg0, %c0_i32 : i32, i32
  }
  func.func @transform_1(%arg0: i32, %arg1: i32) -> (i32, i32) {
    %c0_i32 = arith.constant 0 : i32
    %c0_i32_0 = arith.constant 0 : i32
    return %c0_i32, %arg1 : i32, i32
  }
  func.func @transform_2(%arg0: i32, %arg1: i32) -> (i32, i32) {
    %c0_i32 = arith.constant 0 : i32
    %c0_i32_0 = arith.constant 0 : i32
    return %c0_i32, %arg1 : i32, i32
  }
  func.func @transform_3(%arg0: i32, %arg1: i32) -> (i32, i32) {
    %c0_i32 = arith.constant 0 : i32
    return %arg0, %arg1 : i32, i32
  }
}

</mosaic_0001>

<bundles_post_ra>
// kernel: tpu_custom_call.1
= control target key start
LH: loop header
LB: loop body
LE: loop exit
PB: predicated region body
PF: predicated region fallthrough
CT: control target
= control target key end

     0   :  { %8 = vsyncpa [#allocation3], 0  ;;  %s401_s0 = inlined_call_operand.hbm [shape: f32[8,128], index: 0, kind: input, shape index: {}]   ;;  %s402_s1 = inlined_call_operand.hbm [shape: f32[128,128], index: 1, kind: input, shape index: {}]   ;;  %s403_s2 = inlined_call_operand.vmem [shape: f32[1,128], index: 2, kind: input, shape index: {}]   ;;  %s404_s3 = inlined_call_operand.hbm [shape: f32[8,128], index: 3, kind: output, shape index: {}]  }
   0x1   :  { %9 = vsyncpa [#allocation6], 0 }
   0x2   :  { %10 = vsyncpa [#allocation4], 0  ;;  %s327_s12 = smov [#allocation2]   ;;  %s328_s14 = smov [#allocation5]  }
   0x3   :  { %s17_s13 = sshll.u32 %s327_s12, 4  ;;  %s26_s15 = sshll.u32 %s328_s14, 4  ;;  %s18_s13 = int_to_ptr.vmem [resolvable:$true] %s17_s13  ;;  %s355_s15 = int_to_ptr.vmem [resolvable:$true] %s26_s15 }
   0x4   :  { %s255_s18 = scalar_lea.hbm %s401_s0, 128 }
   0x5   :  { %p256_p0 = scmp.ne.s32.totalorder %s401_s0, %s255_s18  ;;  %p259_p1 = scmp.lt.u32.totalorder %s255_s18, %s401_s0 }
   0x7   :  { %p261_p2 = pnand %p259_p1, %p256_p0 }
   0x9   :  { %264 = shalt.err (!%p261_p2)
}
   0xa   :  { %s265_s23 = scalar_lea.vmem %s18_s13, 128  ;;  %p270_p4 = scmp.lt.s32.totalorder %s18_s13, %s18_s13 }
   0xb   :  { %p266_p3 = scmp.ne.s32.totalorder %s18_s13, %s265_s23  ;;  %p271_p5 = scmp.lt.s32.totalorder %s265_s23, %s265_s23 }
   0xd   :  { %p272_p6 = por %p271_p5, %p270_p4 }
   0xf   :  { %p273_p7 = pnand %p272_p6, %p266_p3 }
  0x11   :  { %276 = shalt.err (!%p273_p7)
}
  0x12   :  { %20 = dma.hbm_to_vmem [thread:$0]  %s401_s0, 128, %s18_s13, [#allocation3]  }
  0x13   :  { %s277_s28 = scalar_lea.hbm %s402_s1, 2048 }
  0x14   :  { %p278_p8 = scmp.ne.s32.totalorder %s402_s1, %s277_s28  ;;  %p281_p9 = scmp.lt.u32.totalorder %s277_s28, %s402_s1 }
  0x16   :  { %p283_p10 = pnand %p281_p9, %p278_p8 }
  0x18   :  { %286 = shalt.err (!%p283_p10)
}
  0x19   :  { %s287_s6 = scalar_lea.vmem %s355_s15, 2048  ;;  %p292_p12 = scmp.lt.s32.totalorder %s355_s15, %s355_s15 }
  0x1a   :  { %p288_p11 = scmp.ne.s32.totalorder %s355_s15, %s287_s6  ;;  %p293_p13 = scmp.lt.s32.totalorder %s287_s6, %s287_s6 }
  0x1c   :  { %p294_p0 = por %p293_p13, %p292_p12 }
  0x1e   :  { %p295_p1 = pnand %p294_p0, %p288_p11 }
  0x20   :  { %298 = shalt.err (!%p295_p1)
}
  0x21   :  { %s329_s0 = smov 128   ;;  %s330_s7 = smov 8  }
  0x22   :  { %32 = dma.hbm_to_vmem [thread:$0]  %s402_s1, 2048, %s355_s15, [#allocation6], %s329_s0, %s329_s0, %s330_s7  }
  0x23   :  { %321 = dma.done.wait [#allocation3], 128  }
  0x24   :  { %322 = vsyncadd [#allocation3], 4294967168 }
  0x25   :  { %323 = dma.done.wait [#allocation6], 2048  }
  0x26   :  { %324 = vsyncadd [#allocation6], 4294965248  ;;  %v331_v0 = vmov 0.0|0.0   ;;  %vm332_vm0 = vmmov 0   ;;  %v333_v1 = vmov 0.0   ;;  %v42_v2 = vld [vmem:[#allocation5] sm:$0xff] }
  0x27   :  { %219 = vmatprep.subr.bf16.mxu0 %v331_v0  ;;  %216 = vmatprep.mubr.msk.f32.mxu0 %vm332_vm0, %v333_v1  ;;  %v43_v3 = vld [vmem:[#allocation5 + $0x8] sm:$0xff]  ;;  %v44_v4 = vld [vmem:[#allocation5 + $0x10] sm:$0xff]  ;;  %v45_v6 = vld [vmem:[#allocation5 + $0x18] sm:$0xff]  ;;  %s334_s11 = smov [#allocation7]  }
  0x28   :  { %v220_v5 = vpack.c.bf16 %v43_v3, %v42_v2  ;;  %v223_v7 = vpack.c.bf16 %v45_v6, %v44_v4  ;;  %v46_v8 = vld [vmem:[#allocation5 + $0x20] sm:$0xff]  ;;  %v47_v9 = vld [vmem:[#allocation5 + $0x28] sm:$0xff]  ;;  %v41_v10 = vld [vmem:[#allocation2] sm:$0xff]  ;;  %s156_s12 = sshll.u32 %s334_s11, 4  ;;  %s157_s12 = int_to_ptr.vmem [resolvable:$true] %s156_s12 }
  0x29   :  { %v128_v11 = vmul.f32 %v41_v10, %v41_v10  ;;  %v226_v12 = vpack.c.bf16 %v47_v9, %v46_v8  ;;  %v48_v13 = vld [vmem:[#allocation5 + $0x30] sm:$0xff]  ;;  %v49_v14 = vld [vmem:[#allocation5 + $0x38] sm:$0xff]  ;;  %v50_v16 = vld [vmem:[#allocation5 + $0x40] sm:$0xff]  ;;  %s299_s13 = scalar_lea.vmem %s157_s12, 128  ;;  %p304_p3 = scmp.lt.s32.totalorder %s157_s12, %s157_s12 }
  0x2a   :  { %221 = vmatpush3.bf16.msra.mxu0 %v220_v5  ;;  %v229_v15 = vpack.c.bf16 %v49_v14, %v48_v13  ;;  %v51_v17 = vld [vmem:[#allocation5 + $0x48] sm:$0xff]  ;;  %v52_v19 = vld [vmem:[#allocation5 + $0x50] sm:$0xff]  ;;  %v53_v20 = vld [vmem:[#allocation5 + $0x58] sm:$0xff]  ;;  %p300_p2 = scmp.ne.s32.totalorder %s157_s12, %s299_s13  ;;  %p305_p4 = scmp.lt.s32.totalorder %s299_s13, %s299_s13 }
  0x2b   :  { %222 = vmatprep.subr.bf16.mxu0 %v331_v0  ;;  %129 = vadd.xlane.f32.xlu0 %v128_v11  ;;  %v232_v18 = vpack.c.bf16 %v51_v17, %v50_v16  ;;  %v235_v21 = vpack.c.bf16 %v53_v20, %v52_v19  ;;  %v54_v22 = vld [vmem:[#allocation5 + $0x60] sm:$0xff]  ;;  %v55_v23 = vld [vmem:[#allocation5 + $0x68] sm:$0xff]  ;;  %v56_v25 = vld [vmem:[#allocation5 + $0x70] sm:$0xff] }
  0x2c   :  { %v238_v24 = vpack.c.bf16 %v55_v23, %v54_v22  ;;  %v57_v26 = vld [vmem:[#allocation5 + $0x78] sm:$0xff]  ;;  %p306_p5 = por %p305_p4, %p304_p3 }
  0x2d   :  { %v241_v27 = vpack.c.bf16 %v57_v26, %v56_v25  ;;  %v166_v40 = vld [vmem:[%s403_s2] ss:$0 sm:$0xff] }
  0x2e   :  { %224 = vmatpush3.bf16.msra.mxu0 %v223_v7  ;;  %p307_p6 = pnand %p306_p5, %p300_p2 }
  0x2f   :  { %225 = vmatprep.subr.bf16.mxu0 %v331_v0 }
  0x32   :  { %227 = vmatpush3.bf16.msra.mxu0 %v226_v12 }
  0x33   :  { %228 = vmatprep.subr.bf16.mxu0 %v331_v0 }
  0x36   :  { %230 = vmatpush3.bf16.msra.mxu0 %v229_v15 }
  0x37   :  { %231 = vmatprep.subr.bf16.mxu0 %v331_v0 }
  0x3a   :  { %233 = vmatpush3.bf16.msra.mxu0 %v232_v18 }
  0x3b   :  { %234 = vmatprep.subr.bf16.mxu0 %v331_v0 }
  0x3e   :  { %236 = vmatpush3.bf16.msra.mxu0 %v235_v21 }
  0x3f   :  { %237 = vmatprep.subr.bf16.mxu0 %v331_v0 }
  0x42   :  { %239 = vmatpush3.bf16.msra.mxu0 %v238_v24 }
  0x43   :  { %240 = vmatprep.subr.bf16.mxu0 %v331_v0 }
  0x46   :  { %242 = vmatpush3.bf16.msra.mxu0 %v241_v27 }
  0x49   :  { %217 = vmatmul.mubr.f32.vlgmr.msra.gmra.mrb[0].mxu0 %v41_v10 }
  0xb8   :  { %v130_v28 = vpop.xlane.xlu0 %129 }
  0xb9   :  { %v131_v29 = vadd.f32 1.0, %v130_v28 }
  0xbb   :  { %v134_v30 = vsub.f32 2.0, %v131_v29 }
  0xbd   :  { %v135_v31 = vmax.f32 %v134_v30, 1e-15 }
  0xbf   :  { %251 = vlog2.f32 %v135_v31 }
  0xc9   :  { %v252_v36 = vpop.eup %251 }
  0xca   :  { %v138_v37 = vmul.f32 0.6931472, %v252_v36 }
 0x11c   :  { %v124_v32 = vpop.f32.mrb[0].mxu0 }
 0x11d   :  { %v132_v33 = vsub.f32 %v131_v29, %v124_v32  ;;  %v218_v34 = vpop.f32.mrb[1].mxu0 }
 0x11f   :  { %v133_v35 = vmax.f32 %v132_v33, 1e-15 }
 0x121   :  { %253 = vlog2.f32 %v133_v35 }
 0x12b   :  { %v254_v38 = vpop.eup %253 }
 0x12c   :  { %v140_v39 = vmul.f32 0.6931472, %v254_v38 }
 0x12e   :  { %v141_v41 = vsub.f32 %v138_v37, %v140_v39 }
 0x130   :  { %v148_v42 = vadd.f32 %v166_v40, %v141_v41 }
 0x132   :  { %149 = vst [vmem:[#allocation7] sm:$0xff] %v148_v42 }
 0x133   :  { %310 = shalt.err (!%p307_p6)
}
 0x134   :  { %s311_s16 = scalar_lea.hbm %s404_s3, 128 }
 0x135   :  { %p312_p7 = scmp.ne.s32.totalorder %s404_s3, %s311_s16  ;;  %p315_p8 = scmp.lt.u32.totalorder %s311_s16, %s404_s3 }
 0x137   :  { %p317_p9 = pnand %p315_p8, %p312_p7 }
 0x139   :  { %320 = shalt.err (!%p317_p9)
}
 0x13a   :  { %159 = dma.vmem_to_hbm [thread:$0]  %s157_s12, 128, %s404_s3, [#allocation4]  }
 0x13b   :  { %325 = dma.done.wait [#allocation4], 128  }
 0x13c   :  { %326 = vsyncadd [#allocation4], 4294967168 }
 0x13d   :  { %163 = vsyncpa [#allocation3], 1 }
 0x13e   :  { %164 = vsyncpa [#allocation6], 1 }
 0x13f   :  { %165 = vsyncpa [#allocation4], 1 }

</bundles_post_ra>
